<compile_context>
chip_gen: v7x
topology: tpu7x:2x2x1
jax: 0.10.0
libtpu: 0.0.40
codegen_flags: <defaults>
</compile_context>

<pallas_src>
import numpy as np
import jax
import jax.numpy as jnp
from jax import lax
from jax.experimental import pallas as pl
from jax.experimental.pallas import tpu as pltpu

# --------------------------------------------------------------------------
# Problem sizes (small synthetic BFM)
# --------------------------------------------------------------------------
N_VERT = 128                     # synthetic BFM vertices
N_ALPHA = 16                     # identity (alpha) basis size
N_DELTA = 8                      # expression (delta) basis size
N_LMK = 12                       # number of landmarks
K_USED = N_ALPHA + N_DELTA + 1   # [alpha | delta | 1.0(mean)]
K_PAD = 32                       # K padded to a sublane multiple
L_PAD = 16                       # landmarks padded so sublane slices are 8-aligned
TB = 128                         # candidates per grid tile (lane axis)

_FOCAL, _CX, _CY = 10.0, 0.5, 0.5


# --------------------------------------------------------------------------
# Pallas kernel: one batch tile of TB candidates
# --------------------------------------------------------------------------
def _bfm_batched_kernel(basis_ref, coeff_ref, m_ref, uv_ref):
    """Candidates live on the lane axis.

    basis_ref: (3*L_PAD, K_PAD) VMEM  row (c*L_PAD + l) =
               [E_id[c,:,idx_l] | E_exp[c,:,idx_l] | mu[c,idx_l] | 0-pad]
    coeff_ref: (K_PAD, TB)      VMEM  column b = [alpha_b | delta_b | 1 | 0-pad]
    m_ref    : (3, 4, TB)       VMEM  per-candidate rows {0,1,3} of M = P @ T(omega,t)
    uv_ref   : (2, L_PAD, TB)   VMEM  output: uv[0]=u, uv[1]=v (lane-dense)
    """
    # Landmark geometry for all TB candidates in a single MXU dot.
    g = jnp.dot(basis_ref[...], coeff_ref[...],
                preferred_element_type=jnp.float32,
                precision=lax.Precision.HIGHEST)              # (3*L_PAD, TB)
    gx = g[0:L_PAD, :]
    gy = g[L_PAD:2 * L_PAD, :]
    gz = g[2 * L_PAD:3 * L_PAD, :]

    m = m_ref[...]                                            # (3, 4, TB)
    # p_r[l, b] = M_r0[b]*x + M_r1[b]*y + M_r2[b]*z + M_r3[b]   (homogeneous w == 1)
    p0 = m[0, 0:1] * gx + m[0, 1:2] * gy + m[0, 2:3] * gz + m[0, 3:4]
    p1 = m[1, 0:1] * gx + m[1, 1:2] * gy + m[1, 2:3] * gz + m[1, 3:4]
    p3 = m[2, 0:1] * gx + m[2, 1:2] * gy + m[2, 2:3] * gz + m[2, 3:4]

    # Exact homogeneous divide (approx reciprocal fails the 1e-3 check).
    inv = 1.0 / p3
    uv_ref[0] = p0 * inv
    uv_ref[1] = p1 * inv


# --------------------------------------------------------------------------
# Host-side packing (static, hoisted out of the per-call path)
# --------------------------------------------------------------------------
def pack_landmark_basis(mu, e_id, e_exp, landmark_idx):
    """Done ONCE per BFM model: gather landmark columns and pack
    [E_id | E_exp | mu | 0-pad] per coordinate into the (3*L_PAD, K_PAD)
    MXU operand expected by the kernel."""
    mu = np.asarray(mu, np.float32)          # (3, N)
    e_id = np.asarray(e_id, np.float32)      # (3, N_ALPHA, N)
    e_exp = np.asarray(e_exp, np.float32)    # (3, N_DELTA, N)
    idx = np.asarray(landmark_idx)
    out = np.zeros((3 * L_PAD, K_PAD), np.float32)
    for c in range(3):                       # x, y, z coordinate blocks
        rows = slice(c * L_PAD, c * L_PAD + N_LMK)
        out[rows, 0:N_ALPHA] = e_id[c][:, idx].T
        out[rows, N_ALPHA:N_ALPHA + N_DELTA] = e_exp[c][:, idx].T
        out[rows, N_ALPHA + N_DELTA] = mu[c, idx]
    return jnp.asarray(out)


def _pack_coeff(alpha, delta):
    """(B, N_ALPHA), (B, N_DELTA) -> (K_PAD, B) coefficient columns."""
    b = alpha.shape[0]
    return jnp.concatenate([
        jnp.transpose(alpha).astype(jnp.float32),
        jnp.transpose(delta).astype(jnp.float32),
        jnp.ones((1, b), jnp.float32),
        jnp.zeros((K_PAD - K_USED, b), jnp.float32)], axis=0)


def _combined_transform_rows(omega, t, focal=_FOCAL, cx=_CX, cy=_CY):
    """Rows {0, 1, 3} of M = P @ T(omega, t) for every candidate: (3, 4, B)."""
    sx, cxo = jnp.sin(omega[:, 0]), jnp.cos(omega[:, 0])
    sy, cyo = jnp.sin(omega[:, 1]), jnp.cos(omega[:, 1])
    sz, czo = jnp.sin(omega[:, 2]), jnp.cos(omega[:, 2])
    r00 = czo * cyo
    r01 = czo * sy * sx - sz * cxo
    r02 = czo * sy * cxo + sz * sx
    r10 = sz * cyo
    r11 = sz * sy * sx + czo * cxo
    r12 = sz * sy * cxo - czo * sx
    r20 = -sy
    r21 = cyo * sx
    r22 = cyo * cxo
    t0, t1, t2 = t[:, 0], t[:, 1], t[:, 2]
    row0 = jnp.stack([focal * r00 + cx * r20, focal * r01 + cx * r21,
                      focal * r02 + cx * r22, focal * t0 + cx * t2], axis=0)
    row1 = jnp.stack([focal * r10 + cy * r20, focal * r11 + cy * r21,
                      focal * r12 + cy * r22, focal * t1 + cy * t2], axis=0)
    row2 = jnp.stack([r20, r21, r22, t2], axis=0)
    return jnp.stack([row0, row1, row2], axis=0).astype(jnp.float32)


# --------------------------------------------------------------------------
# Batched forward (Model.forward() for B candidate parameter sets)
# --------------------------------------------------------------------------
def bfm_forward(basis_lmk, alpha, delta, omega, t):
    """Returns landmarks of shape (B, N_LMK, 2)."""
    b = alpha.shape[0]
    bp = ((b + TB - 1) // TB) * TB
    if bp != b:                              # pad batch to a tile multiple
        pad = bp - b
        alpha = jnp.pad(alpha, ((0, pad), (0, 0)))
        delta = jnp.pad(delta, ((0, pad), (0, 0)))
        omega = jnp.pad(omega, ((0, pad), (0, 0)))
        # pad translation with 1.0 so dead lanes never divide by zero
        t = jnp.pad(t, ((0, pad), (0, 0)), constant_values=1.0)

    coeff = _pack_coeff(alpha, delta)                  # (K_PAD, bp)
    m_rows = _combined_transform_rows(omega, t)        # (3, 4, bp)

    flops = 2 * (3 * L_PAD) * K_PAD * bp + 30 * L_PAD * bp
    bytes_accessed = 4 * (3 * L_PAD * K_PAD + K_PAD * bp + 12 * bp
                          + 2 * L_PAD * bp)

    uv = pl.pallas_call(
        _bfm_batched_kernel,
        out_shape=jax.ShapeDtypeStruct((2, L_PAD, bp), jnp.float32),
        grid=(bp // TB,),
        in_specs=[
            pl.BlockSpec((3 * L_PAD, K_PAD), lambda i: (0, 0)),
            pl.BlockSpec((K_PAD, TB), lambda i: (0, i)),
            pl.BlockSpec((3, 4, TB), lambda i: (0, 0, i)),
        ],
        out_specs=pl.BlockSpec((2, L_PAD, TB), lambda i: (0, 0, i)),
        compiler_params=pltpu.CompilerParams(
            dimension_semantics=("parallel",)),
        cost_estimate=pl.CostEstimate(flops=flops, transcendentals=0,
                                      bytes_accessed=bytes_accessed),
    )(basis_lmk, coeff, m_rows)                        # (2, L_PAD, bp)

    # Module return layout: per candidate (N_LMK, 2). Drop landmark / batch
    # padding and move candidates to the front (output formatting only).
    return jnp.transpose(uv[:, :N_LMK, :b], (2, 1, 0))


bfm_forward_jit = jax.jit(bfm_forward)


# --------------------------------------------------------------------------
# Pure-JAX reference (un-fused P / T path) for correctness checking
# --------------------------------------------------------------------------
_HI = lax.Precision.HIGHEST


def _rotation_matrix(omega):
    cx_, sx_ = jnp.cos(omega[0]), jnp.sin(omega[0])
    cy_, sy_ = jnp.cos(omega[1]), jnp.sin(omega[1])
    cz_, sz_ = jnp.cos(omega[2]), jnp.sin(omega[2])
    one, zero = jnp.ones(()), jnp.zeros(())
    Rx = jnp.stack([jnp.stack([one, zero, zero]),
                    jnp.stack([zero, cx_, -sx_]),
                    jnp.stack([zero, sx_, cx_])])
    Ry = jnp.stack([jnp.stack([cy_, zero, sy_]),
                    jnp.stack([zero, one, zero]),
                    jnp.stack([-sy_, zero, cy_])])
    Rz = jnp.stack([jnp.stack([cz_, -sz_, zero]),
                    jnp.stack([sz_, cz_, zero]),
                    jnp.stack([zero, zero, one])])
    return jnp.matmul(jnp.matmul(Rz, Ry, precision=_HI), Rx, precision=_HI)


def _rigid_matrix(omega, t):
    R = _rotation_matrix(omega)
    top = jnp.concatenate([R, t.reshape(3, 1)], axis=1)
    bot = jnp.array([[0.0, 0.0, 0.0, 1.0]], jnp.float32)
    return jnp.concatenate([top, bot], axis=0).astype(jnp.float32)


def _projection_matrix(focal=_FOCAL, cx=_CX, cy=_CY):
    return jnp.array([[focal, 0.0, cx, 0.0],
                      [0.0, focal, cy, 0.0],
                      [0.0, 0.0, 1.0, 0.0],
                      [0.0, 0.0, 1.0, 0.0]], jnp.float32)


def _reference_forward_single(alpha, delta, mu, e_id, e_exp, omega, t,
                              landmark_idx):
    G = (mu
         + jnp.einsum('a,can->cn', alpha, e_id, precision=_HI)
         + jnp.einsum('d,cdn->cn', delta, e_exp, precision=_HI))
    Gh = jnp.concatenate([G, jnp.ones((1, G.shape[1]), jnp.float32)], axis=0)
    X = jnp.matmul(_rigid_matrix(omega, t), Gh, precision=_HI)
    p = jnp.matmul(_projection_matrix(), X, precision=_HI)
    uv = p[0:2] / p[3:4]
    return uv.T[landmark_idx]                          # (N_LMK, 2)


# --------------------------------------------------------------------------
if __name__ == "__main__":
    key = jax.random.PRNGKey(0)
    ks = jax.random.split(key, 9)
    B = 256   # multiple of 256 (v6e/v7x MXU) and of 128 (v5e), per perf review

    # BFM "model" constants (small synthetic shapes)
    mu = jax.random.normal(ks[0], (3, N_VERT), jnp.float32)
    e_id = 0.1 * jax.random.normal(ks[1], (3, N_ALPHA, N_VERT), jnp.float32)
    e_exp = 0.1 * jax.random.normal(ks[2], (3, N_DELTA, N_VERT), jnp.float32)
    landmark_idx = np.asarray(jax.random.permutation(ks[3], N_VERT)[:N_LMK])

    # B candidate latent-parameter sets
    alpha = jax.random.normal(ks[4], (B, N_ALPHA), jnp.float32)
    delta = jax.random.normal(ks[5], (B, N_DELTA), jnp.float32)
    omega = 0.1 * jax.random.normal(ks[6], (B, 3), jnp.float32)
    t = jnp.concatenate(
        [0.1 * jax.random.normal(ks[7], (B, 2), jnp.float32),
         10.0 + jax.random.uniform(ks[8], (B, 1), jnp.float32)], axis=1)

    # Hoisted out of the per-call path: packed, landmark-gathered basis
    # (device-resident constant in a real estimation loop).
    basis_lmk = pack_landmark_basis(mu, e_id, e_exp, landmark_idx)

    landmarks = bfm_forward_jit(basis_lmk, alpha, delta, omega, t)
    landmarks = jax.block_until_ready(landmarks)
    assert landmarks.shape == (B, N_LMK, 2)

    ref = jax.vmap(_reference_forward_single,
                   in_axes=(0, 0, None, None, None, 0, 0, None))(
        alpha, delta, mu, e_id, e_exp, omega, t, jnp.asarray(landmark_idx))
    ref = jax.block_until_ready(ref)

    np.testing.assert_allclose(np.asarray(landmarks), np.asarray(ref),
                               rtol=1e-3, atol=1e-3)
    print("KERNEL_OK")
</pallas_src>

<mosaic_0001>
module attributes {stable_mosaic.version = 11 : i64} {
  func.func @_bfm_batched_kernel(%arg0: i32, %arg1: memref<48x32xf32, #tpu.memory_space<vmem>>, %arg2: memref<32x128xf32, #tpu.memory_space<vmem>>, %arg3: memref<3x4x128xf32, #tpu.memory_space<vmem>>, %arg4: memref<2x16x128xf32, #tpu.memory_space<vmem>>) attributes {dimension_semantics = [#tpu.dimension_semantics<parallel>], iteration_bounds = array<i64: 2>, scalar_prefetch = 0 : i64, scratch_operands = 0 : i64, tpu.core_type = #tpu.core_type<tc>, window_params = [{pipeline_mode = #tpu.pipeline_mode<synchronous>, transform_indices = @transform_0, window_bounds = array<i64: 48, 32>}, {transform_indices = @transform_1, window_bounds = array<i64: 32, 128>}, {transform_indices = @transform_2, window_bounds = array<i64: 3, 4, 128>}, {transform_indices = @transform_3, window_bounds = array<i64: 2, 16, 128>}]} {
    %c0 = arith.constant 0 : index
    %c0_0 = arith.constant 0 : index
    %0 = vector.load %arg1[%c0, %c0_0] : memref<48x32xf32, #tpu.memory_space<vmem>>, vector<48x32xf32>
    %c0_1 = arith.constant 0 : index
    %c0_2 = arith.constant 0 : index
    %1 = vector.load %arg2[%c0_1, %c0_2] : memref<32x128xf32, #tpu.memory_space<vmem>>, vector<32x128xf32>
    %cst = arith.constant dense<0.000000e+00> : vector<48x128xf32>
    %2 = tpu.matmul %0, %1, %cst {dimension_numbers = #tpu.dot_dimension_numbers<[1], [0], [0], [1], [0, 0, 1, 1], [], []>, precision = #tpu.contract_precision<fp32>} : vector<48x32xf32>, vector<32x128xf32>, vector<48x128xf32> -> vector<48x128xf32>
    %3 = vector.extract_strided_slice %2 {offsets = [0, 0], sizes = [16, 128], strides = [1, 1]} : vector<48x128xf32> to vector<16x128xf32>
    %4 = vector.extract_strided_slice %2 {offsets = [16, 0], sizes = [16, 128], strides = [1, 1]} : vector<48x128xf32> to vector<16x128xf32>
    %5 = vector.extract_strided_slice %2 {offsets = [32, 0], sizes = [16, 128], strides = [1, 1]} : vector<48x128xf32> to vector<16x128xf32>
    %c0_3 = arith.constant 0 : index
    %c0_4 = arith.constant 0 : index
    %c0_5 = arith.constant 0 : index
    %6 = vector.load %arg3[%c0_3, %c0_4, %c0_5] : memref<3x4x128xf32, #tpu.memory_space<vmem>>, vector<3x4x128xf32>
    %7 = vector.extract_strided_slice %6 {offsets = [0, 0, 0], sizes = [1, 1, 128], strides = [1, 1, 1]} : vector<3x4x128xf32> to vector<1x1x128xf32>
    %8 = vector.shape_cast %7 : vector<1x1x128xf32> to vector<1x128xf32>
    %9 = vector.broadcast %8 : vector<1x128xf32> to vector<16x128xf32>
    %10 = arith.mulf %9, %3 : vector<16x128xf32>
    %11 = vector.extract_strided_slice %6 {offsets = [0, 1, 0], sizes = [1, 1, 128], strides = [1, 1, 1]} : vector<3x4x128xf32> to vector<1x1x128xf32>
    %12 = vector.shape_cast %11 : vector<1x1x128xf32> to vector<1x128xf32>
    %13 = vector.broadcast %12 : vector<1x128xf32> to vector<16x128xf32>
    %14 = arith.mulf %13, %4 : vector<16x128xf32>
    %15 = arith.addf %10, %14 : vector<16x128xf32>
    %16 = vector.extract_strided_slice %6 {offsets = [0, 2, 0], sizes = [1, 1, 128], strides = [1, 1, 1]} : vector<3x4x128xf32> to vector<1x1x128xf32>
    %17 = vector.shape_cast %16 : vector<1x1x128xf32> to vector<1x128xf32>
    %18 = vector.broadcast %17 : vector<1x128xf32> to vector<16x128xf32>
    %19 = arith.mulf %18, %5 : vector<16x128xf32>
    %20 = arith.addf %15, %19 : vector<16x128xf32>
    %21 = vector.extract_strided_slice %6 {offsets = [0, 3, 0], sizes = [1, 1, 128], strides = [1, 1, 1]} : vector<3x4x128xf32> to vector<1x1x128xf32>
    %22 = vector.shape_cast %21 : vector<1x1x128xf32> to vector<1x128xf32>
    %23 = vector.broadcast %22 : vector<1x128xf32> to vector<16x128xf32>
    %24 = arith.addf %20, %23 : vector<16x128xf32>
    %25 = vector.extract_strided_slice %6 {offsets = [1, 0, 0], sizes = [1, 1, 128], strides = [1, 1, 1]} : vector<3x4x128xf32> to vector<1x1x128xf32>
    %26 = vector.shape_cast %25 : vector<1x1x128xf32> to vector<1x128xf32>
    %27 = vector.broadcast %26 : vector<1x128xf32> to vector<16x128xf32>
    %28 = arith.mulf %27, %3 : vector<16x128xf32>
    %29 = vector.extract_strided_slice %6 {offsets = [1, 1, 0], sizes = [1, 1, 128], strides = [1, 1, 1]} : vector<3x4x128xf32> to vector<1x1x128xf32>
    %30 = vector.shape_cast %29 : vector<1x1x128xf32> to vector<1x128xf32>
    %31 = vector.broadcast %30 : vector<1x128xf32> to vector<16x128xf32>
    %32 = arith.mulf %31, %4 : vector<16x128xf32>
    %33 = arith.addf %28, %32 : vector<16x128xf32>
    %34 = vector.extract_strided_slice %6 {offsets = [1, 2, 0], sizes = [1, 1, 128], strides = [1, 1, 1]} : vector<3x4x128xf32> to vector<1x1x128xf32>
    %35 = vector.shape_cast %34 : vector<1x1x128xf32> to vector<1x128xf32>
    %36 = vector.broadcast %35 : vector<1x128xf32> to vector<16x128xf32>
    %37 = arith.mulf %36, %5 : vector<16x128xf32>
    %38 = arith.addf %33, %37 : vector<16x128xf32>
    %39 = vector.extract_strided_slice %6 {offsets = [1, 3, 0], sizes = [1, 1, 128], strides = [1, 1, 1]} : vector<3x4x128xf32> to vector<1x1x128xf32>
    %40 = vector.shape_cast %39 : vector<1x1x128xf32> to vector<1x128xf32>
    %41 = vector.broadcast %40 : vector<1x128xf32> to vector<16x128xf32>
    %42 = arith.addf %38, %41 : vector<16x128xf32>
    %43 = vector.extract_strided_slice %6 {offsets = [2, 0, 0], sizes = [1, 1, 128], strides = [1, 1, 1]} : vector<3x4x128xf32> to vector<1x1x128xf32>
    %44 = vector.shape_cast %43 : vector<1x1x128xf32> to vector<1x128xf32>
    %45 = vector.broadcast %44 : vector<1x128xf32> to vector<16x128xf32>
    %46 = arith.mulf %45, %3 : vector<16x128xf32>
    %47 = vector.extract_strided_slice %6 {offsets = [2, 1, 0], sizes = [1, 1, 128], strides = [1, 1, 1]} : vector<3x4x128xf32> to vector<1x1x128xf32>
    %48 = vector.shape_cast %47 : vector<1x1x128xf32> to vector<1x128xf32>
    %49 = vector.broadcast %48 : vector<1x128xf32> to vector<16x128xf32>
    %50 = arith.mulf %49, %4 : vector<16x128xf32>
    %51 = arith.addf %46, %50 : vector<16x128xf32>
    %52 = vector.extract_strided_slice %6 {offsets = [2, 2, 0], sizes = [1, 1, 128], strides = [1, 1, 1]} : vector<3x4x128xf32> to vector<1x1x128xf32>
    %53 = vector.shape_cast %52 : vector<1x1x128xf32> to vector<1x128xf32>
    %54 = vector.broadcast %53 : vector<1x128xf32> to vector<16x128xf32>
    %55 = arith.mulf %54, %5 : vector<16x128xf32>
    %56 = arith.addf %51, %55 : vector<16x128xf32>
    %57 = vector.extract_strided_slice %6 {offsets = [2, 3, 0], sizes = [1, 1, 128], strides = [1, 1, 1]} : vector<3x4x128xf32> to vector<1x1x128xf32>
    %58 = vector.shape_cast %57 : vector<1x1x128xf32> to vector<1x128xf32>
    %59 = vector.broadcast %58 : vector<1x128xf32> to vector<16x128xf32>
    %60 = arith.addf %56, %59 : vector<16x128xf32>
    %cst_6 = arith.constant 1.000000e+00 : f32
    %61 = vector.broadcast %cst_6 : f32 to vector<16x128xf32>
    %62 = arith.divf %61, %60 : vector<16x128xf32>
    %63 = arith.mulf %24, %62 : vector<16x128xf32>
    %c0_7 = arith.constant 0 : index
    %c0_8 = arith.constant 0 : index
    %c0_9 = arith.constant 0 : index
    %64 = vector.load %arg4[%c0_7, %c0_8, %c0_9] : memref<2x16x128xf32, #tpu.memory_space<vmem>>, vector<1x16x128xf32>
    %65 = vector.shape_cast %64 : vector<1x16x128xf32> to vector<16x128xf32>
    %66 = vector.shape_cast %63 : vector<16x128xf32> to vector<1x16x128xf32>
    tpu.vector_store %arg4[%c0_7, %c0_8, %c0_9], %66 {strides = array<i32>} : memref<2x16x128xf32, #tpu.memory_space<vmem>>, vector<1x16x128xf32>,
    %67 = arith.mulf %42, %62 : vector<16x128xf32>
    %c1 = arith.constant 1 : index
    %c0_10 = arith.constant 0 : index
    %c0_11 = arith.constant 0 : index
    %68 = vector.load %arg4[%c1, %c0_10, %c0_11] : memref<2x16x128xf32, #tpu.memory_space<vmem>>, vector<1x16x128xf32>
    %69 = vector.shape_cast %68 : vector<1x16x128xf32> to vector<16x128xf32>
    %70 = vector.shape_cast %67 : vector<16x128xf32> to vector<1x16x128xf32>
    tpu.vector_store %arg4[%c1, %c0_10, %c0_11], %70 {strides = array<i32>} : memref<2x16x128xf32, #tpu.memory_space<vmem>>, vector<1x16x128xf32>,
    return
  }
  func.func @transform_0(%arg0: i32) -> (i32, i32) {
    %c0_i32 = arith.constant 0 : i32
    %c0_i32_0 = arith.constant 0 : i32
    %c0_i32_1 = arith.constant 0 : i32
    return %c0_i32, %c0_i32_0 : i32, i32
  }
  func.func @transform_1(%arg0: i32) -> (i32, i32) {
    %c0_i32 = arith.constant 0 : i32
    %c0_i32_0 = arith.constant 0 : i32
    return %c0_i32, %arg0 : i32, i32
  }
  func.func @transform_2(%arg0: i32) -> (i32, i32, i32) {
    %c0_i32 = arith.constant 0 : i32
    %c0_i32_0 = arith.constant 0 : i32
    %c0_i32_1 = arith.constant 0 : i32
    return %c0_i32, %c0_i32_0, %arg0 : i32, i32, i32
  }
  func.func @transform_3(%arg0: i32) -> (i32, i32, i32) {
    %c0_i32 = arith.constant 0 : i32
    %c0_i32_0 = arith.constant 0 : i32
    %c0_i32_1 = arith.constant 0 : i32
    return %c0_i32, %c0_i32_0, %arg0 : i32, i32, i32
  }
}

</mosaic_0001>

<bundles_post_ra>
// kernel: bfm_forward.1
= control target key start
LH: loop header
LB: loop body
LE: loop exit
PB: predicated region body
PF: predicated region fallthrough
CT: control target
= control target key end

     0   :  { %s1566_s12 = smov 0   ;;  %s1568_s13 = smov 0   ;;  %s1770_s0 = inlined_call_operand.vmem [shape: f32[48,32], index: 0, kind: input, shape index: {}]   ;;  %s1771_s1 = inlined_call_operand.vmem [shape: f32[32,256], index: 1, kind: input, shape index: {}]   ;;  %s1772_s2 = inlined_call_operand.vmem [shape: f32[3,4,256], index: 2, kind: input, shape index: {}]   ;;  %s1773_s3 = inlined_call_operand.vmem [shape: f32[2,16,256], index: 3, kind: output, shape index: {}]  }
   0x1   :  { %s1570_s14 = smov 0  }
   0x2 LB: > { %s1236_s15 = sadd.s32 4294967295, %s1544_s14   ;;  %s1583_s16 = sadd.s32 1, %s1544_s14   ;;  %s1544_s14 = sphi %s1570_s14, %s1778_s14   ;;  %s1540_s13 = sphi %s1568_s13, %s1777_s13   ;;  %s1536_s12 = sphi %s1566_s12, %s1776_s12  }
   0x3   : > { %s38_s17 = ssub.s32 %s1544_s14, %s1583_s16  ;;  %s41_s18 = sadd.s32 1, %s1540_s13 }
   0x4   : > { %p39_p0 = scmp.eq.s32.totalorder %s38_s17, 0  ;;  %p48_p1 = scmp.ne.s32.totalorder %s1540_s13, %s1536_s12 }
   0x5   : > { %p49_p2 = scmp.eq.s32.totalorder %s1544_s14, 0  ;;  %p104_p3 = scmp.eq.s32.totalorder %s1236_s15, 1 }
   0x6   : > { %s1594_s19 = scalar_select %p39_p0, %s1540_s13, %s41_s18  }
   0x7   : > { %p1596_p4 = por %p49_p2, %p48_p1  ;;  %p1600_p5 = por %p104_p3, %p48_p1 }
   0x8   : > { %p1239_p6 = scmp.ge.s32.totalorder %s1544_s14, 2 }
   0xa   : > { %129 = sbr.rel (%p1239_p6) target bundleno = 31 (0x1f), region = 20 }
  0x11   : > { %132 = sbr.rel (!%p1596_p4) target bundleno = 24 (0x18), region = 24  ;;  %s134_s22 = sand.u32 (%p1596_p4), 1, %s1540_s13  }
  0x12   : > { %s1241_s23 = sshll.u32 (%p1596_p4), %s1544_s14, 3  ;;  %s1240_s24 = sshll.u32 (%p1596_p4), %s134_s22, 5 }
  0x13   : > { %s138_s27 = scalar_lea.vmem (%p1596_p4), %s1771_s1, %s1241_s23  ;;  %s136_s28 = scalar_lea.vmem (%p1596_p4), [#allocation2], %s1240_s24 }
  0x14   : > { %v172_v0 = vld [vmem:[%s138_s27] sm:$0xff] (%p1596_p4)  ;;  %v174_v1 = vld [vmem:[%s138_s27 + $0x10] sm:$0xff] (%p1596_p4) }
  0x15   : > { %v176_v2 = vld [vmem:[%s138_s27 + $0x20] sm:$0xff] (%p1596_p4)  ;;  %173 = vst [vmem:[%s136_s28] sm:$0xff] (%p1596_p4), %v172_v0  ;;  %175 = vst [vmem:[%s136_s28 + $0x8] sm:$0xff] (%p1596_p4), %v174_v1  ;;  %v178_v3 = vld [vmem:[%s138_s27 + $0x30] sm:$0xff] (%p1596_p4) }
  0x16   : > { %177 = vst [vmem:[%s136_s28 + $0x10] sm:$0xff] (%p1596_p4), %v176_v2  ;;  %179 = vst [vmem:[%s136_s28 + $0x18] sm:$0xff] (%p1596_p4), %v178_v3 }
  0x18 PF: > { %185 = sbr.rel (!%p1596_p4) target bundleno = 31 (0x1f), region = 62  ;;  %s187_s29 = sand.u32 (%p1596_p4), 1, %s1540_s13  }
  0x19   : > { %s1242_s30 = sshll.u32 (%p1596_p4), %s1544_s14, 2  ;;  %s1492_s4 = smul.u32 (%p1596_p4), 12, %s187_s29 }
  0x1a   : > { %s191_s7 = scalar_lea.vmem (%p1596_p4), %s1772_s2, %s1242_s30 }
  0x1b   : > { %v207_v4 = vld [vmem:[%s191_s7] sm:$0xf] (%p1596_p4)  ;;  %v209_v5 = vld [vmem:[%s191_s7 + $0x8] sm:$0xf] (%p1596_p4)  ;;  %v211_v6 = vld [vmem:[%s191_s7 + $0x10] sm:$0xf] (%p1596_p4) }
  0x1c   : > { %s189_s8 = scalar_lea.vmem (%p1596_p4), [#allocation3], %s1492_s4 }
  0x1d   : > { %208 = vst [vmem:[%s189_s8] sm:$0xf] (%p1596_p4), %v207_v4  ;;  %210 = vst [vmem:[%s189_s8 + $0x4] sm:$0xf] (%p1596_p4), %v209_v5 }
  0x1e   : > { %212 = vst [vmem:[%s189_s8 + $0x8] sm:$0xf] (%p1596_p4), %v211_v6 }
  0x1f PF: > { %p1243_p7 = scmp.ge.s32.totalorder %s1544_s14, 1  ;;  %p240_p8 = scmp.lt.s32.totalorder %s1544_s14, 3 }
  0x21   : > { %p241_p9 = pnand %p1243_p7, %p240_p8 }
  0x22   : > { %s247_s9 = sand.u32 (!%p241_p9), 1, %s1536_s12   ;;  %v280_v7 = vld [vmem:[%s1770_s0] sm:$0xff] (!%p241_p9)  ;;  %vm290_vm0 = vcmask (!%p241_p9), 261120   ;;  %v281_v8 = vld [vmem:[%s1770_s0 + $0x8] sm:$0xff] (!%p241_p9)  ;;  %v282_v9 = vld [vmem:[%s1770_s0 + $0x10] sm:$0xff] (!%p241_p9) }
  0x23   : > { %244 = sbr.rel (%p241_p9) target bundleno = 326 (0x146), region = 103  ;;  %s1633_s23 = sshll.u32 (!%p241_p9), %s247_s9, 5  ;;  %v292_v10 = vsel (!%p241_p9), %vm290_vm0, %v280_v7, 0  ;;  %v295_v11 = vsel (!%p241_p9), %vm290_vm0, %v281_v8, 0  ;;  %v298_v12 = vsel (!%p241_p9), %vm290_vm0, %v282_v9, 0  ;;  %v283_v13 = vld [vmem:[%s1770_s0 + $0x18] sm:$0xff] (!%p241_p9) }
  0x24   : > { %v284_v14 = vld [vmem:[%s1770_s0 + $0x20] sm:$0xff] (!%p241_p9)  ;;  %v1644_v15 = vand.u32 (!%p241_p9), 4294901760, %v292_v10  ;;  %v1646_v16 = vand.u32 (!%p241_p9), 4294901760, %v295_v11  ;;  %v1648_v17 = vand.u32 (!%p241_p9), 4294901760, %v298_v12  ;;  %v301_v18 = vsel (!%p241_p9), %vm290_vm0, %v283_v13, 0  ;;  %s249_s28 = scalar_lea.vmem (!%p241_p9), [#allocation2], %s1633_s23 }
  0x25   : > { %v286_v19 = vld [vmem:[%s249_s28] sm:$0xff] (!%p241_p9)  ;;  %v287_v20 = vld [vmem:[%s249_s28 + $0x8] sm:$0xff] (!%p241_p9)  ;;  %v288_v21 = vld [vmem:[%s249_s28 + $0x10] sm:$0xff] (!%p241_p9)  ;;  %v1652_v22 = vand.u32 (!%p241_p9), 4294901760, %v301_v18  ;;  %v304_v23 = vsel (!%p241_p9), %vm290_vm0, %v284_v14, 0  ;;  %s1493_s4 = smul.u32 (!%p241_p9), 12, %s247_s9 }
  0x26   : > { %v310_v24 = vand.u32 (!%p241_p9), 4294901760, %v286_v19  ;;  %v313_v25 = vand.u32 (!%p241_p9), 4294901760, %v287_v20  ;;  %v289_v26 = vld [vmem:[%s249_s28 + $0x18] sm:$0xff] (!%p241_p9)  ;;  %v316_v27 = vand.u32 (!%p241_p9), 4294901760, %v288_v21  ;;  %v1656_v28 = vsub.f32 (!%p241_p9), %v292_v10, %v1644_v15  ;;  %v285_v37 = vld [vmem:[%s1770_s0 + $0x28] sm:$0xff] (!%p241_p9)  ;;  %s279_s12 = scalar_lea.vmem (!%p241_p9), [#allocation4], %s1633_s23 }
  0x27   : > { %v319_v29 = vand.u32 (!%p241_p9), 4294901760, %v289_v26  ;;  %v1659_v30 = vsub.f32 (!%p241_p9), %v295_v11, %v1646_v16  ;;  %v1662_v31 = vsub.f32 (!%p241_p9), %v298_v12, %v1648_v17  ;;  %v1665_v32 = vsub.f32 (!%p241_p9), %v301_v18, %v1652_v22  ;;  %s256_s5 = scalar_lea.vmem (!%p241_p9), [#allocation3], %s1493_s4 }
  0x28   : > { %v1667_v33 = vpack.c.bf16 (!%p241_p9), %v313_v25, %v310_v24  ;;  %v380_v34 = vand.u32 (!%p241_p9), 4294901760, %v1656_v28  ;;  %v1670_v35 = vsub.f32 (!%p241_p9), %v286_v19, %v310_v24  ;;  %v447_v36 = vsub.f32 (!%p241_p9), %v287_v20, %v313_v25  ;;  %v1011_v24 = vld [vmem:[%s256_s5 + $0x8] sm:$0xf] (!%p241_p9) }
  0x29   : > { %v1675_v38 = vpack.c.bf16 (!%p241_p9), %v319_v29, %v316_v27  ;;  %v390_v39 = vand.u32 (!%p241_p9), 4294901760, %v1659_v30  ;;  %v400_v40 = vand.u32 (!%p241_p9), 4294901760, %v1662_v31  ;;  %v410_v41 = vand.u32 (!%p241_p9), 4294901760, %v1665_v32 }
  0x2a   : > { %1415 = vmatprep.subr.bf16.mxu1 %v1667_v33  ;;  %1439 = vmatprep.subr.bf16.mxu0 %v1667_v33  ;;  %v381_v42 = vsub.f32 %v1656_v28, %v380_v34  ;;  %v441_v43 = vand.u32 4294901760, %v1670_v35  ;;  %v448_v44 = vand.u32 4294901760, %v447_v36  ;;  %v1684_v45 = vsub.f32 %v288_v21, %v316_v27  ;;  %v1740_v21 = vld [vmem:[%s256_s5] sm:$0xf]  ;;  %s1249_s6 = sshll.u32 (%p1600_p5), %s1236_s15, 3 }
  0x2b   : > { %1417 = vmatpush3.bf16.msra.mxu1 %v1667_v33  ;;  %1441 = vmatpush3.bf16.msra.mxu0 %v1667_v33  ;;  %v391_v46 = vsub.f32 %v1659_v30, %v390_v39  ;;  %v401_v47 = vsub.f32 %v1662_v31, %v400_v40  ;;  %v1690_v48 = vand.u32 4294901760, %v304_v23  ;;  %v307_v49 = vsel %vm290_vm0, %v285_v37, 0  ;;  %s1117_s9 = scalar_lea.vmem (%p1600_p5), %s1773_s3, %s1249_s6 }
  0x2c   : > { %1419 = vmatprep.subr.bf16.mxu1 %v1675_v38  ;;  %1443 = vmatprep.subr.bf16.mxu0 %v1675_v38  ;;  %v382_v50 = vand.u32 4294901760, %v381_v42  ;;  %v442_v51 = vsub.f32 %v1670_v35, %v441_v43  ;;  %v449_v52 = vsub.f32 %v447_v36, %v448_v44  ;;  %v1446_v53 = vpack.c.bf16 %v448_v44, %v441_v43 }
  0x2d   : > { %1371 = vmatprep.mubr.f32.mxu0 %v380_v34  ;;  %v392_v54 = vand.u32 4294901760, %v391_v46  ;;  %v411_v55 = vsub.f32 %v1665_v32, %v410_v41  ;;  %v455_v56 = vand.u32 4294901760, %v1684_v45  ;;  %v461_v59 = vsub.f32 %v289_v26, %v319_v29 }
  0x2e   : > { %1320 = vmatprep.mubr.f32.mxu1 %v382_v50  ;;  %v443_v57 = vand.u32 4294901760, %v442_v51  ;;  %v450_v58 = vand.u32 4294901760, %v449_v52  ;;  %v1699_v60 = vsub.f32 %v304_v23, %v1690_v48  ;;  %v1704_v62 = vand.u32 4294901760, %v307_v49  ;;  %v1742_v23 = vld [vmem:[%s256_s5 + $0x4] sm:$0xf] }
  0x2f   : > { %1421 = vmatpush3.bf16.msra.mxu1 %v1675_v38  ;;  %1445 = vmatpush3.bf16.msra.mxu0 %v1675_v38  ;;  %v456_v61 = vsub.f32 %v1684_v45, %v455_v56  ;;  %v402_v0 = vand.u32 4294901760, %v401_v47  ;;  %v462_v1 = vand.u32 4294901760, %v461_v59  ;;  %v412_v3 = vand.u32 4294901760, %v411_v55 }
  0x30   : > { %v1422_v63 = vpack.c.bf16 %v450_v58, %v443_v57  ;;  %1447 = vmatprep.subr.bf16.mxu0 %v1446_v53  ;;  %v420_v2 = vand.u32 4294901760, %v1699_v60  ;;  %v429_v4 = vsub.f32 %v307_v49, %v1704_v62  ;;  %v1430_v14 = vpack.c.bf16 %v447_v36, %v1670_v35 }
  0x31   : > { %v457_v5 = vand.u32 4294901760, %v456_v61  ;;  %v463_v6 = vsub.f32 %v461_v59, %v462_v1  ;;  %v1450_v7 = vpack.c.bf16 %v462_v1, %v455_v56  ;;  %v1434_v19 = vpack.c.bf16 %v461_v59, %v1684_v45 }
  0x32   : > { %1321 = vmatmul.mubr.f32.vlgmr.msra.gmra.mrb[0].mxu1 %v392_v54  ;;  %1423 = vmatprep.subr.bf16.mxu1 %v1422_v63  ;;  %v421_v8 = vsub.f32 %v1699_v60, %v420_v2  ;;  %v430_v9 = vand.u32 4294901760, %v429_v4 }
  0x33   : > { %1372 = vmatmul.mubr.f32.vlgmr.msra.gmra.mrb[0].mxu0 %v390_v39  ;;  %1425 = vmatpush3.bf16.msra.mxu1 %v1422_v63  ;;  %v464_v10 = vand.u32 4294901760, %v463_v6 }
  0x34   : > { %1449 = vmatpush3.bf16.msra.mxu0 %v1446_v53  ;;  %1323 = vmatprep.mubr.f32.mxu1 %v402_v0  ;;  %v422_v11 = vand.u32 4294901760, %v421_v8  ;;  %v431_v12 = vsub.f32 %v429_v4, %v430_v9 }
  0x35   : > { %1374 = vmatprep.mubr.f32.mxu0 %v400_v40  ;;  %1451 = vmatprep.subr.bf16.mxu0 %v1450_v7  ;;  %v1426_v13 = vpack.c.bf16 %v464_v10, %v457_v5 }
  0x36   : > { %1324 = vmatmul.mubr.f32.gmra.mrb[2].mxu1 %v412_v3  ;;  %v432_v18 = vand.u32 4294901760, %v431_v12 }
  0x37   : > { %1375 = vmatmul.mubr.f32.gmra.mrb[2].mxu0 %v410_v41  ;;  %1326 = vmatprep.mubr.f32.mxu1 %v422_v11 }
  0x38   : > { %1427 = vmatprep.subr.bf16.mxu1 %v1426_v13  ;;  %1377 = vmatprep.mubr.f32.mxu0 %v420_v2 }
  0x39   : > { %1429 = vmatpush3.bf16.msra.mxu1 %v1426_v13  ;;  %1453 = vmatpush3.bf16.msra.mxu0 %v1450_v7 }
  0x3a   : > { %1327 = vmatmul.mubr.f32.gmra.mrb[4].mxu1 %v432_v18  ;;  %1431 = vmatprep.subr.bf16.mxu1 %v1430_v14 }
  0x3b   : > { %1378 = vmatmul.mubr.f32.gmra.mrb[4].mxu0 %v430_v9  ;;  %1337 = vmatprep.mubr.f32.mxu1 %v1644_v15 }
  0x3c   : > { %1388 = vmatprep.mubr.f32.mxu0 %v1644_v15  ;;  %1455 = vmatprep.subr.bf16.mxu0 %v1667_v33 }
  0x3e   : > { %1338 = vmatmul.mubr.f32.vlgmr.msra.gmra.mrb[0].mxu1 %v1646_v16 }
  0x3f   : > { %1389 = vmatmul.mubr.f32.vlgmr.msra.gmra.mrb[0].mxu0 %v1646_v16  ;;  %1433 = vmatpush3.bf16.msra.mxu1 %v1430_v14 }
  0x40   : > { %1457 = vmatpush3.bf16.msra.mxu0 %v1667_v33  ;;  %1340 = vmatprep.mubr.f32.mxu1 %v1648_v17 }
  0x41   : > { %1391 = vmatprep.mubr.f32.mxu0 %v1648_v17  ;;  %1435 = vmatprep.subr.bf16.mxu1 %v1434_v19 }
  0x42   : > { %1341 = vmatmul.mubr.f32.gmra.mrb[2].mxu1 %v1652_v22  ;;  %1459 = vmatprep.subr.bf16.mxu0 %v1675_v38 }
  0x43   : > { %1392 = vmatmul.mubr.f32.gmra.mrb[2].mxu0 %v1652_v22  ;;  %1343 = vmatprep.mubr.f32.mxu1 %v1690_v48 }
  0x44   : > { %1437 = vmatpush3.bf16.msra.mxu1 %v1434_v19  ;;  %1394 = vmatprep.mubr.f32.mxu0 %v1690_v48 }
  0x45   : > { %1461 = vmatpush3.bf16.msra.mxu0 %v1675_v38 }
  0x46   : > { %1344 = vmatmul.mubr.f32.gmra.mrb[4].mxu1 %v1704_v62 }
  0x47   : > { %1395 = vmatmul.mubr.f32.gmra.mrb[4].mxu0 %v1704_v62  ;;  %1354 = vmatprep.mubr.f32.mxu1 %v1656_v28 }
  0x48   : > { %1405 = vmatprep.mubr.f32.mxu0 %v1644_v15  ;;  %v1012_v15 = vlaneseq }
  0x4a   : > { %1355 = vmatmul.mubr.f32.vlgmr.msra.gmra.mrb[0].mxu1 %v1659_v30  ;;  %v1013_v20 = vshrl.u32 %v1012_v15, 7 }
  0x4b   : > { %1406 = vmatmul.mubr.f32.vlgmr.msra.gmra.mrb[0].mxu0 %v1646_v16  ;;  %1357 = vmatprep.mubr.f32.mxu1 %v1662_v31 }
  0x4c   : > { %1408 = vmatprep.mubr.f32.mxu0 %v1648_v17  ;;  %v1014_v16 = vsub.s32 0, %v1013_v20  ;;  %v1028_v27 = vsub.s32 2, %v1013_v20  ;;  %v1036_v45 = vsub.s32 3, %v1013_v20 }
  0x4e   : > { %1358 = vmatmul.mubr.f32.gmra.mrb[2].mxu1 %v1665_v32  ;;  %v1015_v29 = vrot.slane %v1740_v21, %v1014_v16  ;;  %v1043_v31 = vrot.slane %v1742_v23, %v1014_v16  ;;  %v1071_v32 = vrot.slane %v1011_v24, %v1014_v16  ;;  %v1029_v40 = vrot.slane %v1740_v21, %v1028_v27 }
  0x4f   : > { %1409 = vmatmul.mubr.f32.gmra.mrb[2].mxu0 %v1652_v22  ;;  %1360 = vmatprep.mubr.f32.mxu1 %v1699_v60  ;;  %v1020_v22 = vsub.s32 1, %v1013_v20  ;;  %v1057_v41 = vrot.slane %v1742_v23, %v1028_v27  ;;  %v1085_v46 = vrot.slane %v1011_v24, %v1028_v27  ;;  %v1093_v10 = vrot.slane %v1011_v24, %v1036_v45 }
  0x50   : > { %1411 = vmatprep.mubr.f32.mxu0 %v1690_v48 }
  0x51   : > { %v1021_v35 = vrot.slane %v1740_v21, %v1020_v22  ;;  %v1049_v36 = vrot.slane %v1742_v23, %v1020_v22  ;;  %v1077_v37 = vrot.slane %v1011_v24, %v1020_v22 }
  0x52   : > { %1361 = vmatmul.mubr.f32.gmra.mrb[4].mxu1 %v429_v4 }
  0x53   : > { %1412 = vmatmul.mubr.f32.gmra.mrb[4].mxu0 %v1704_v62 }
 0x11d   : > { %v1356_v17 = vpop.f32.mrb[0].mxu1 }
 0x11e   : > { %v1407_v25 = vpop.f32.mrb[0].mxu0  ;;  %v635_v26 = vpop.f32.mrb[1].mxu1 }
 0x11f   : > { %v1462_v28 = vadd.f32 %v1407_v25, %v1356_v17  ;;  %v975_v30 = vpop.f32.mrb[1].mxu0  ;;  %v1037_v25 = vrot.slane %v1740_v21, %v1036_v45 }
 0x120   : > { %v1463_v33 = vadd.f32 %v975_v30, %v635_v26  ;;  %v1065_v26 = vrot.slane %v1742_v23, %v1036_v45 }
 0x121   : > { %v1359_v34 = vpop.f32.mrb[2].mxu1  ;;  %v1017_v42 = vmul.f32 %v1462_v28, %v1015_v29  ;;  %v1045_v47 = vmul.f32 %v1462_v28, %v1043_v31  ;;  %v1073_v48 = vmul.f32 %v1462_v28, %v1071_v32 }
 0x122   : > { %v1410_v38 = vpop.f32.mrb[2].mxu0  ;;  %v649_v39 = vpop.f32.mrb[3].mxu1  ;;  %v1016_v49 = vmul.f32 %v1463_v33, %v1015_v29  ;;  %v1044_v51 = vmul.f32 %v1463_v33, %v1043_v31  ;;  %v1072_v56 = vmul.f32 %v1463_v33, %v1071_v32 }
 0x123   : > { %v1464_v43 = vadd.f32 %v1410_v38, %v1359_v34  ;;  %v987_v44 = vpop.f32.mrb[3].mxu0 }
 0x124   : > { %v1465_v50 = vadd.f32 %v987_v44, %v649_v39 }
 0x125   : > { %v1023_v52 = vmul.f32 %v1464_v43, %v1021_v35  ;;  %v1051_v53 = vmul.f32 %v1464_v43, %v1049_v36  ;;  %v1079_v54 = vmul.f32 %v1464_v43, %v1077_v37  ;;  %v1362_v55 = vpop.f32.mrb[4].mxu1 }
 0x126   : > { %v1022_v57 = vmul.f32 %v1465_v50, %v1021_v35  ;;  %v1050_v58 = vmul.f32 %v1465_v50, %v1049_v36  ;;  %v1078_v59 = vmul.f32 %v1465_v50, %v1077_v37  ;;  %v1413_v60 = vpop.f32.mrb[4].mxu0  ;;  %v663_v61 = vpop.f32.mrb[5].mxu1 }
 0x127   : > { %v1025_v62 = vadd.f32 %v1023_v52, %v1017_v42  ;;  %v1053_v63 = vadd.f32 %v1051_v53, %v1045_v47  ;;  %v1081_v0 = vadd.f32 %v1079_v54, %v1073_v48  ;;  %v1466_v1 = vadd.f32 %v1413_v60, %v1362_v55  ;;  %v999_v2 = vpop.f32.mrb[5].mxu0 }
 0x128   : > { %v1024_v3 = vadd.f32 %v1022_v57, %v1016_v49  ;;  %v1052_v4 = vadd.f32 %v1050_v58, %v1044_v51  ;;  %v1080_v5 = vadd.f32 %v1078_v59, %v1072_v56  ;;  %v1467_v6 = vadd.f32 %v999_v2, %v663_v61 }
 0x129   : > { %v1031_v7 = vmul.f32 %v1466_v1, %v1029_v40  ;;  %v1059_v8 = vmul.f32 %v1466_v1, %v1057_v41  ;;  %v1087_v9 = vmul.f32 %v1466_v1, %v1085_v46 }
 0x12a   : > { %v1030_v11 = vmul.f32 %v1467_v6, %v1029_v40  ;;  %v1058_v12 = vmul.f32 %v1467_v6, %v1057_v41  ;;  %v1086_v13 = vmul.f32 %v1467_v6, %v1085_v46 }
 0x12b   : > { %v1033_v14 = vadd.f32 %v1031_v7, %v1025_v62  ;;  %v1061_v18 = vadd.f32 %v1059_v8, %v1053_v63  ;;  %v1089_v19 = vadd.f32 %v1087_v9, %v1081_v0 }
 0x12c   : > { %v1032_v15 = vadd.f32 %v1030_v11, %v1024_v3  ;;  %v1060_v20 = vadd.f32 %v1058_v12, %v1052_v4  ;;  %v1088_v16 = vadd.f32 %v1086_v13, %v1080_v5 }
 0x12d   : > { %v1095_v17 = vadd.f32 %v1093_v10, %v1089_v19  ;;  %v1039_v27 = vadd.f32 %v1037_v25, %v1033_v14  ;;  %v1067_v24 = vadd.f32 %v1065_v26, %v1061_v18 }
 0x12e   : > { %v1094_v22 = vadd.f32 %v1093_v10, %v1088_v16  ;;  %v1038_v29 = vadd.f32 %v1037_v25, %v1032_v15  ;;  %v1066_v30 = vadd.f32 %v1065_v26, %v1060_v20 }
 0x12f   : > { %1518 = vrcp.f32 %v1095_v17 }
 0x130   : > { %1520 = vrcp.f32 %v1094_v22 }
 0x137   : > { %1115 = sbr.rel (!%p1600_p5) target bundleno = 326 (0x146), region = 115 }
 0x139   : > { %v1519_v28 = vpop.eup %1518 }
 0x13a   : > { %v1521_v31 = vpop.eup %1520  ;;  %v1101_v32 = vmul.f32 %v1519_v28, %v1039_v27  ;;  %v1105_v33 = vmul.f32 %v1519_v28, %v1067_v24 }
 0x13b   : > { %v1100_v34 = vmul.f32 %v1521_v31, %v1038_v29  ;;  %v1104_v35 = vmul.f32 %v1521_v31, %v1066_v30 }
 0x13c   : > { %1103 = vst [vmem:[%s279_s12 + $0x8] sm:$0xff] %v1101_v32  ;;  %1247 = vst [vmem:[%s279_s12 + $0x18] sm:$0xff] %v1105_v33 }
 0x13d   : > { %1102 = vst [vmem:[%s279_s12] sm:$0xff] %v1100_v34  ;;  %1246 = vst [vmem:[%s279_s12 + $0x10] sm:$0xff] %v1104_v35 }
 0x143   : > { %v1153_v23 = vld [vmem:[%s279_s12 + $0x8] sm:$0xff]  ;;  %v1157_v37 = vld [vmem:[%s279_s12 + $0x18] sm:$0xff] }
 0x144   : > { %v1151_v21 = vld [vmem:[%s279_s12] sm:$0xff]  ;;  %v1155_v36 = vld [vmem:[%s279_s12 + $0x10] sm:$0xff]  ;;  %1154 = vst [vmem:[%s1117_s9 + $0x10] sm:$0xff] %v1153_v23  ;;  %1158 = vst [vmem:[%s1117_s9 + $0x30] sm:$0xff] %v1157_v37 }
 0x145   : > { %1152 = vst [vmem:[%s1117_s9] sm:$0xff] %v1151_v21  ;;  %1156 = vst [vmem:[%s1117_s9 + $0x20] sm:$0xff] %v1155_v36 }
 0x146 PF: > { %p10_p10 = scmp.ge.s32.totalorder %s1583_s16, 4   ;;  %s1776_s12 = smov %s1540_s13 }
 0x147   : > { %s1777_s13 = smov %s1594_s19  ;;  %s1778_s14 = smov %s1583_s16 }
 0x148   :  { %12 = sbr.rel (!%p10_p10) target bundleno = 2 (0x2), region = 193 }

</bundles_post_ra>
